<compile_context>
chip_gen: v5e
topology: v5e:2x2
jax: 0.10.0
libtpu: 0.0.40
codegen_flags: <defaults>
</compile_context>

<pallas_src>
import jax
import jax.numpy as jnp
import numpy as np
from jax.experimental import pallas as pl
from jax.experimental.pallas import tpu as pltpu


def _round_up(n, m):
    return ((n + m - 1) // m) * m


# ------------------------- Pallas kernel -------------------------

def prompt_adapter_kernel(x_ref, wdw_ref, bdw_ref, wup_ref, bup_ref, o_ref):
    """Fused: relu( relu(x @ Wdw + bdw) @ Wup + bup + x )."""
    # Down-projection on the MXU, f32 accumulation.
    h = jnp.dot(x_ref[...], wdw_ref[...], preferred_element_type=jnp.float32)
    h = jnp.maximum(h + bdw_ref[...], 0.0)                         # ReLU, (tm, dhp) f32
    # Up-projection: feed the MXU in the weight dtype (bf16 on the bf16 path).
    y = jnp.dot(h.astype(wup_ref.dtype), wup_ref[...],
                preferred_element_type=jnp.float32)                # (tm, D) f32
    # Bias + residual.  Re-read x from the resident VMEM input tile so the
    # (tm, D) activation is not live across both matmuls (avoids vreg spills
    # at large tiles); the extra vld is free (vld slots are not the bottleneck).
    y = y + bup_ref[...] + x_ref[...].astype(jnp.float32)
    o_ref[...] = jnp.maximum(y, 0.0).astype(o_ref.dtype)           # ReLU


# ------------------------- tiling helpers -------------------------

def _vmem_limit_bytes():
    """Generation-aware scoped-VMEM limit (v5e/v6e: 128 MiB phys, v7x: 64 MiB)."""
    cap = 64 << 20  # conservative fallback = v7x physical VMEM
    try:
        info = pltpu.get_tpu_info()
        cap = int(getattr(info, "vmem_capacity_bytes", cap) or cap)
    except Exception:
        pass
    # Leave headroom below physical for compiler-internal scratch.
    return int(min(cap * 7 // 8, 112 << 20))


def _pick_row_tile(m, in_dim, dhp, io_bytes, vmem_limit, tm_max):
    """Largest row tile that fits the VMEM budget (and keeps grid >= 2)."""
    # Resident (single-buffered) weights + f32 biases.
    weight_bytes = 2 * in_dim * dhp * io_bytes + (dhp + in_dim) * 4
    budget = int(vmem_limit * 3 // 4) - weight_bytes
    # Per row: double-buffered input + output tiles (io dtype) plus the f32
    # intermediates (h, y, f32 residual) the compiler materializes.
    per_row = 4 * in_dim * io_bytes + (dhp + 2 * in_dim) * 4
    tm = budget // max(per_row, 1)
    tm = max(min(tm, tm_max, 1024), 8)
    # Keep both TensorCores busy on v7x for medium m, and never exceed the
    # (8-rounded) row count.
    tm = min(tm, _round_up(-(-m // 2), 8), _round_up(m, 8))
    if tm >= 128:
        tm = (tm // 128) * 128       # MXU-friendly row count
    else:
        tm = _round_up(tm, 8)        # satisfy the (8, 128) block constraint
    return int(tm)


def _resident_spec(shape):
    """Grid-invariant block: single-buffer it (no prefetch overlap needed)."""
    try:
        return pl.BlockSpec(shape, lambda i: (0, 0), pipeline_mode=pl.Buffered(1))
    except Exception:
        # Older Pallas without pipeline_mode/Buffered: default double-buffering.
        return pl.BlockSpec(shape, lambda i: (0, 0))


# ------------------------- wrapper -------------------------

def prompt_adapter_forward(x, params, *, tm_max=1024):
    """x: (..., in_dim), any float dtype. Weights stored as (in, out) == torch W.T."""
    orig_shape = x.shape
    in_dim = orig_shape[-1]
    dh = params["w_dw"].shape[1]
    dhp = max(_round_up(dh, 128), 128)       # lane-dense hidden dim

    x2 = x.reshape(-1, in_dim)               # keep caller dtype (bf16 stays bf16)
    m = x2.shape[0]
    io_dtype = x2.dtype
    io_bytes = jnp.dtype(io_dtype).itemsize

    # Weight matrices in the activation dtype (bf16 MXU inputs on the bf16 path);
    # biases stay f32 and are added to the f32 accumulator.
    w_dw = params["w_dw"].astype(io_dtype)
    w_up = params["w_up"].astype(io_dtype)
    b_dw = params["b_dw"].reshape(1, -1).astype(jnp.float32)
    b_up = params["b_up"].reshape(1, -1).astype(jnp.float32)
    if dhp != dh:
        # Zero-pad the hidden dim to a multiple of 128 (exact: extra W_dw
        # columns / W_up rows / b_dw entries are zero and contribute nothing).
        w_dw = jnp.pad(w_dw, ((0, 0), (0, dhp - dh)))
        b_dw = jnp.pad(b_dw, ((0, 0), (0, dhp - dh)))
        w_up = jnp.pad(w_up, ((0, dhp - dh), (0, 0)))

    vmem_limit = _vmem_limit_bytes()
    tm = _pick_row_tile(m, in_dim, dhp, io_bytes, vmem_limit, tm_max)

    out = pl.pallas_call(
        prompt_adapter_kernel,
        out_shape=jax.ShapeDtypeStruct((m, in_dim), io_dtype),
        grid=(pl.cdiv(m, tm),),              # ragged last block: Pallas masks it
        in_specs=[
            pl.BlockSpec((tm, in_dim), lambda i: (i, 0)),   # activation tile
            _resident_spec((in_dim, dhp)),                  # W_dw (resident, 1-buffered)
            _resident_spec((1, dhp)),                       # b_dw
            _resident_spec((dhp, in_dim)),                  # W_up
            _resident_spec((1, in_dim)),                    # b_up
        ],
        out_specs=pl.BlockSpec((tm, in_dim), lambda i: (i, 0)),
        compiler_params=pltpu.CompilerParams(
            dimension_semantics=("parallel",),              # megacore on v7x
            vmem_limit_bytes=vmem_limit),
    )(x2, w_dw, b_dw, w_up, b_up)

    return out.reshape(orig_shape)


# ------------------------- params (torch nn.Linear-style init) -------------------------

def init_params(key, in_dim):
    dh = in_dim // 8
    k1, k2, k3, k4 = jax.random.split(key, 4)
    s1 = 1.0 / np.sqrt(in_dim)   # linear_dw: fan_in = in_dim
    s2 = 1.0 / np.sqrt(dh)       # linear_up: fan_in = in_dim // 8
    u = jax.random.uniform
    return {
        # stored as (in, out) == torch weight.T, so the kernel does plain x @ W
        "w_dw": u(k1, (in_dim, dh), jnp.float32, -s1, s1),
        "b_dw": u(k2, (dh,),        jnp.float32, -s1, s1),
        "w_up": u(k3, (dh, in_dim), jnp.float32, -s2, s2),
        "b_up": u(k4, (in_dim,),    jnp.float32, -s2, s2),
    }


# ------------------------- pure-JAX reference -------------------------

def prompt_adapter_ref(x, params):
    xf = x.astype(jnp.float32)
    h = jax.nn.relu(xf @ params["w_dw"] + params["b_dw"])
    return jax.nn.relu(h @ params["w_up"] + params["b_up"] + xf)


# ------------------------- main -------------------------

if __name__ == "__main__":
    key = jax.random.PRNGKey(0)
    in_dim = 256                                  # dh = 32 (zero-padded to 128 in-kernel)
    kx, kw, kx2 = jax.random.split(key, 3)
    params = init_params(kw, in_dim)

    # 1) f32, tile-aligned row count.
    x = jax.random.normal(kx, (2, 8, in_dim), jnp.float32)
    out = jax.block_until_ready(prompt_adapter_forward(x, params))
    ref = prompt_adapter_ref(x, params)
    assert out.shape == x.shape and out.dtype == x.dtype
    np.testing.assert_allclose(np.asarray(out), np.asarray(ref), rtol=2e-4, atol=2e-4)

    # 2) f32, ragged row count (m = 21: exercises the masked ragged last block).
    x_rag = jax.random.normal(kx2, (3, 7, in_dim), jnp.float32)
    out_rag = jax.block_until_ready(prompt_adapter_forward(x_rag, params))
    np.testing.assert_allclose(np.asarray(out_rag),
                               np.asarray(prompt_adapter_ref(x_rag, params)),
                               rtol=2e-4, atol=2e-4)

    # 3) bf16 I/O path (half the activation HBM traffic); loose tolerance vs f32 ref.
    x_bf = x.astype(jnp.bfloat16)
    out_bf = jax.block_until_ready(prompt_adapter_forward(x_bf, params))
    assert out_bf.dtype == jnp.bfloat16
    np.testing.assert_allclose(np.asarray(out_bf.astype(jnp.float32)),
                               np.asarray(prompt_adapter_ref(x_bf, params)),
                               rtol=5e-2, atol=6e-2)

    print("KERNEL_OK")
</pallas_src>

<mosaic_0001>
module attributes {stable_mosaic.version = 11 : i64} {
  func.func @prompt_adapter_kernel(%arg0: i32, %arg1: memref<8x256xf32, #tpu.memory_space<vmem>>, %arg2: memref<256x128xf32, #tpu.memory_space<vmem>>, %arg3: memref<1x128xf32, #tpu.memory_space<vmem>>, %arg4: memref<128x256xf32, #tpu.memory_space<vmem>>, %arg5: memref<1x256xf32, #tpu.memory_space<vmem>>, %arg6: memref<8x256xf32, #tpu.memory_space<vmem>>) attributes {dimension_semantics = [#tpu.dimension_semantics<parallel>], iteration_bounds = array<i64: 2>, scalar_prefetch = 0 : i64, scratch_operands = 0 : i64, tpu.core_type = #tpu.core_type<tc>, window_params = [{transform_indices = @transform_0, window_bounds = array<i64: 8, 256>}, {pipeline_mode = #tpu.pipeline_mode<synchronous>, transform_indices = @transform_1, window_bounds = array<i64: 256, 128>}, {pipeline_mode = #tpu.pipeline_mode<synchronous>, transform_indices = @transform_2, window_bounds = array<i64: 1, 128>}, {pipeline_mode = #tpu.pipeline_mode<synchronous>, transform_indices = @transform_3, window_bounds = array<i64: 128, 256>}, {pipeline_mode = #tpu.pipeline_mode<synchronous>, transform_indices = @transform_4, window_bounds = array<i64: 1, 256>}, {transform_indices = @transform_5, window_bounds = array<i64: 8, 256>}]} {
    %c0 = arith.constant 0 : index
    %c0_0 = arith.constant 0 : index
    %0 = vector.load %arg1[%c0, %c0_0] : memref<8x256xf32, #tpu.memory_space<vmem>>, vector<8x256xf32>
    %c0_1 = arith.constant 0 : index
    %c0_2 = arith.constant 0 : index
    %1 = vector.load %arg2[%c0_1, %c0_2] : memref<256x128xf32, #tpu.memory_space<vmem>>, vector<256x128xf32>
    %cst = arith.constant dense<0.000000e+00> : vector<8x128xf32>
    %2 = tpu.matmul %0, %1, %cst {dimension_numbers = #tpu.dot_dimension_numbers<[1], [0], [0], [1], [0, 0, 1, 1], [], []>} : vector<8x256xf32>, vector<256x128xf32>, vector<8x128xf32> -> vector<8x128xf32>
    %c0_3 = arith.constant 0 : index
    %c0_4 = arith.constant 0 : index
    %3 = vector.load %arg3[%c0_3, %c0_4] : memref<1x128xf32, #tpu.memory_space<vmem>>, vector<1x128xf32>
    %4 = vector.broadcast %3 : vector<1x128xf32> to vector<8x128xf32>
    %5 = arith.addf %2, %4 : vector<8x128xf32>
    %cst_5 = arith.constant 0.000000e+00 : f32
    %6 = vector.broadcast %cst_5 : f32 to vector<8x128xf32>
    %7 = arith.maximumf %5, %6 : vector<8x128xf32>
    %c0_6 = arith.constant 0 : index
    %c0_7 = arith.constant 0 : index
    %8 = vector.load %arg4[%c0_6, %c0_7] : memref<128x256xf32, #tpu.memory_space<vmem>>, vector<128x256xf32>
    %cst_8 = arith.constant dense<0.000000e+00> : vector<8x256xf32>
    %9 = tpu.matmul %7, %8, %cst_8 {dimension_numbers = #tpu.dot_dimension_numbers<[1], [0], [0], [1], [0, 0, 1, 1], [], []>} : vector<8x128xf32>, vector<128x256xf32>, vector<8x256xf32> -> vector<8x256xf32>
    %c0_9 = arith.constant 0 : index
    %c0_10 = arith.constant 0 : index
    %10 = vector.load %arg5[%c0_9, %c0_10] : memref<1x256xf32, #tpu.memory_space<vmem>>, vector<1x256xf32>
    %11 = vector.broadcast %10 : vector<1x256xf32> to vector<8x256xf32>
    %12 = arith.addf %9, %11 : vector<8x256xf32>
    %c0_11 = arith.constant 0 : index
    %c0_12 = arith.constant 0 : index
    %13 = vector.load %arg1[%c0_11, %c0_12] : memref<8x256xf32, #tpu.memory_space<vmem>>, vector<8x256xf32>
    %14 = arith.addf %12, %13 : vector<8x256xf32>
    %cst_13 = arith.constant 0.000000e+00 : f32
    %15 = vector.broadcast %cst_13 : f32 to vector<8x256xf32>
    %16 = arith.maximumf %14, %15 : vector<8x256xf32>
    %c0_14 = arith.constant 0 : index
    %c0_15 = arith.constant 0 : index
    %17 = vector.load %arg6[%c0_14, %c0_15] : memref<8x256xf32, #tpu.memory_space<vmem>>, vector<8x256xf32>
    tpu.vector_store %arg6[%c0_14, %c0_15], %16 {strides = array<i32>} : memref<8x256xf32, #tpu.memory_space<vmem>>, vector<8x256xf32>,
    return
  }
  func.func @transform_0(%arg0: i32) -> (i32, i32) {
    %c0_i32 = arith.constant 0 : i32
    %c0_i32_0 = arith.constant 0 : i32
    return %arg0, %c0_i32 : i32, i32
  }
  func.func @transform_1(%arg0: i32) -> (i32, i32) {
    %c0_i32 = arith.constant 0 : i32
    %c0_i32_0 = arith.constant 0 : i32
    %c0_i32_1 = arith.constant 0 : i32
    return %c0_i32, %c0_i32_0 : i32, i32
  }
  func.func @transform_2(%arg0: i32) -> (i32, i32) {
    %c0_i32 = arith.constant 0 : i32
    %c0_i32_0 = arith.constant 0 : i32
    %c0_i32_1 = arith.constant 0 : i32
    return %c0_i32, %c0_i32_0 : i32, i32
  }
  func.func @transform_3(%arg0: i32) -> (i32, i32) {
    %c0_i32 = arith.constant 0 : i32
    %c0_i32_0 = arith.constant 0 : i32
    %c0_i32_1 = arith.constant 0 : i32
    return %c0_i32, %c0_i32_0 : i32, i32
  }
  func.func @transform_4(%arg0: i32) -> (i32, i32) {
    %c0_i32 = arith.constant 0 : i32
    %c0_i32_0 = arith.constant 0 : i32
    %c0_i32_1 = arith.constant 0 : i32
    return %c0_i32, %c0_i32_0 : i32, i32
  }
  func.func @transform_5(%arg0: i32) -> (i32, i32) {
    %c0_i32 = arith.constant 0 : i32
    %c0_i32_0 = arith.constant 0 : i32
    return %arg0, %c0_i32 : i32, i32
  }
}

</mosaic_0001>

<bundles_post_ra>
// kernel: tpu_custom_call.1
= control target key start
LH: loop header
LB: loop body
LE: loop exit
PB: predicated region body
PF: predicated region fallthrough
CT: control target
= control target key end

     0   :  { %10 = vsyncpa [#allocation3], 0  ;;  %s994_s0 = inlined_call_operand.hbm [shape: f32[16,256], index: 0, kind: input, shape index: {}]   ;;  %s995_s1 = inlined_call_operand.hbm [shape: f32[256,128], index: 1, kind: input, shape index: {}]   ;;  %s996_s2 = inlined_call_operand.vmem [shape: f32[1,128], index: 2, kind: input, shape index: {}]   ;;  %s997_s3 = inlined_call_operand.hbm [shape: f32[128,256], index: 3, kind: input, shape index: {}]   ;;  %s998_s4 = inlined_call_operand.vmem [shape: f32[1,256], index: 4, kind: input, shape index: {}]   ;;  %s999_s5 = inlined_call_operand.hbm [shape: f32[16,256], index: 5, kind: output, shape index: {}]  }
   0x1   :  { %12 = vsyncpa [#allocation3 + $0x1], 0 }
   0x2   :  { %13 = vsyncpa [#allocation6], 0 }
   0x3   :  { %14 = vsyncpa [#allocation4], 0 }
   0x4   :  { %16 = vsyncpa [#allocation4 + $0x1], 0  ;;  %s835_s18 = smov 0   ;;  %s837_s19 = smov 0  }
   0x5   :  { %s839_s20 = smov 0   ;;  %s841_s21 = smov 0  }
   0x6 LB: > { %s174_s24 = sshll.u32 %s995_s1, 4  ;;  %s859_s25 = sadd.s32 4294967295, %s797_s21   ;;  %s797_s21 = sphi %s841_s21, %s1010_s21   ;;  %s793_s20 = sphi %s839_s20, %s1009_s20   ;;  %s789_s19 = sphi %s837_s19, %s1008_s19   ;;  %s785_s18 = sphi %s835_s18, %s1007_s18   ;;  %s175_s24 = int_to_ptr.hbm [resolvable:$true] %s174_s24 }
   0x7   : > { %p546_p0 = scmp.ge.s32.totalorder %s797_s21, 1  ;;  %p43_p1 = scmp.eq.s32.totalorder %s859_s25, 0 }
   0x8   : > { %p163_p2 = scmp.lt.s32.totalorder %s797_s21, 3  ;;  %s799_s27 = smov [#allocation5]  }
   0x9   : > { %s176_s28 = sshll.u32 %s799_s27, 4  ;;  %s191_s6 = sshll.u32 %s997_s3, 4  ;;  %s177_s28 = int_to_ptr.vmem [resolvable:$true] %s176_s28  ;;  %s192_s6 = int_to_ptr.hbm [resolvable:$true] %s191_s6 }
   0xa   : > { %p864_p3 = pnand %p546_p0, %p163_p2  ;;  %s800_s7 = smov [#allocation7]  }
   0xb   : > { %s193_s8 = sshll.u32 %s800_s7, 4  ;;  %s801_s9 = smov 128   ;;  %s194_s8 = int_to_ptr.vmem [resolvable:$true] %s193_s8 }
   0xc   : > { %p577_p4 = pneg %p864_p3  ;;  %s802_s10 = smov 8  }
   0xd   : > { %s803_s11 = smov 256   ;;  %s804_s12 = smov 16  }
   0xe   : > { %p578_p6 = pnand %p577_p4, %p43_p1  ;;  %s545_s13 = sadd.s32 4294967294, %s797_s21  }
   0xf   : > { %s878_s14 = sadd.s32 1, %s797_s21   ;;  %s29_s16 = sadd.s32 1, %s793_s20 }
  0x10   : > { %580 = dma.hbm_to_vmem [thread:$0]  (!%p578_p6), %s175_s24, 4096, %s177_s28, [#allocation6], %s801_s9, %s801_s9, %s802_s10  }
  0x11   : > { %583 = dma.hbm_to_vmem [thread:$0]  (!%p578_p6), %s192_s6, 4096, %s194_s8, [#allocation6], %s803_s11, %s803_s11, %s804_s12  }
  0x12   : > { %s26_s15 = ssub.s32 %s797_s21, %s878_s14  ;;  %p36_p8 = scmp.ne.s32.totalorder %s793_s20, %s789_s19 }
  0x13   : > { %p27_p7 = scmp.eq.s32.totalorder %s26_s15, 0  ;;  %p37_p9 = scmp.eq.s32.totalorder %s797_s21, 0 }
  0x14   : > { %p42_p10 = scmp.ne.s32.totalorder %s789_s19, %s785_s18  ;;  %p150_p13 = scmp.eq.s32.totalorder %s859_s25, 1 }
  0x15   : > { %s889_s17 = scalar_select %p27_p7, %s793_s20, %s29_s16  }
  0x16   : > { %p891_p11 = por %p37_p9, %p36_p8  ;;  %p897_p12 = por %p43_p1, %p42_p10 }
  0x17   : > { %p156_p0 = scmp.eq.s32.totalorder %s545_s13, 1  ;;  %p594_p2 = scmp.lt.s32.totalorder %s797_s21, 2 }
  0x18   : > { %s210_s24 = sand.u32 1, %s793_s20   ;;  %p904_p4 = por %p150_p13, %p36_p8 }
  0x19   : > { %p908_p6 = por %p156_p0, %p42_p10  ;;  %s550_s29 = sshll.u32 %s210_s24, 4 }
  0x1a   : > { %s563_s30 = sshll.u32 %s797_s21, 4  ;;  %s214_s9 = scalar_lea.vmem [#allocation2], %s550_s29 }
  0x1b   : > { %s219_s8 = scalar_lea.hbm %s994_s0, %s563_s30  ;;  %s223_s10 = sshll.u32 %s214_s9, 4  ;;  %s224_s10 = int_to_ptr.vmem [resolvable:$true] %s223_s10 }
  0x1c   : > { %s221_s11 = sshll.u32 %s219_s8, 4  ;;  %p918_p7 = pnand %p594_p2, %p891_p11  ;;  %s222_s11 = int_to_ptr.hbm [resolvable:$true] %s221_s11 }
  0x1d   : > { %s211_s13 = scalar_lea.sflag [#allocation3], %s210_s24  ;;  %s697_s15 = sshra.s32 %s222_s11, 4  ;;  %s698_s15 = int_to_ptr.hbm [resolvable:$true] %s697_s15 }
  0x1e   : > { %s699_s16 = scalar_lea.hbm %s698_s15, 16  ;;  %p701_p9 = pneg %p918_p7 }
  0x1f   : > { %p700_p8 = scmp.ne.s32.totalorder %s698_s15, %s699_s16  ;;  %s704_s6 = scalar_lea.hbm %s994_s0, 32 }
  0x20   : > { %p705_p11 = scmp.lt.s32.totalorder %s698_s15, %s994_s0  ;;  %p706_p0 = scmp.lt.s32.totalorder %s704_s6, %s699_s16 }
  0x21   : > { %p702_p10 = pnand %p701_p9, %p700_p8 }
  0x22   : > { %p707_p2 = por %p706_p0, %p705_p11 }
  0x23   : > { %p703_p13 = pneg %p702_p10 }
  0x25   : > { %p708_p5 = pnand %p707_p2, %p703_p13 }
  0x27   : > { %711 = shalt.err (!%p708_p5)
}
  0x28   : > { %587 = dma.hbm_to_vmem [thread:$0]  (!%p918_p7), %s222_s11, 256, %s224_s10, %s211_s13  }
  0x29   : > { %232 = sbr.rel (%p864_p3) target bundleno = 355 (0x163), region = 40  ;;  %s935_s24 = sand.u32 (!%p864_p3), 1, %s789_s19  }
  0x2a   : > { %s554_s8 = sshll.u32 (!%p864_p3), %s935_s24, 4  ;;  %s235_s9 = scalar_lea.sflag (!%p864_p3), [#allocation3], %s935_s24 }
  0x2b   : > { %s941_s15 = scalar_lea.vmem (!%p864_p3), [#allocation2], %s554_s8 }
  0x2e   : > { %772 = dma.done.wait (%p897_p12), %s235_s9, 256  }
  0x2f   : > { %774 = vsyncadd (%p897_p12), %s235_s9, 4294967040 }
  0x30   : > { %776 = dma.done.wait (%p43_p1), [#allocation6], 8192  }
  0x31   : > { %778 = vsyncadd (%p43_p1), [#allocation6], 4294959104  ;;  %v293_v0 = vld [vmem:[#allocation5 + $0x78] sm:$0xff]  ;;  %v292_v1 = vld [vmem:[#allocation5 + $0x70] sm:$0xff]  ;;  %s564_s12 = sshll.u32 %s859_s25, 4  ;;  %s275_s30 = scalar_lea.vmem [#allocation8], %s554_s8 }
  0x32   : > { %v309_v2 = vld [vmem:[#allocation5 + $0xf8] sm:$0xff]  ;;  %314 = vmatpush.msra.mxu0 %v293_v0  ;;  %v308_v3 = vld [vmem:[#allocation5 + $0xf0] sm:$0xff]  ;;  %v291_v4 = vld [vmem:[#allocation5 + $0x68] sm:$0xff]  ;;  %s451_s29 = scalar_lea.hbm %s999_s5, %s564_s12  ;;  %s453_s6 = sshll.u32 %s275_s30, 4  ;;  %s454_s6 = int_to_ptr.vmem [resolvable:$true] %s453_s6 }
  0x33   : > { %334 = vmatpush.msra.mxu1 %v309_v2  ;;  %v307_v5 = vld [vmem:[#allocation5 + $0xe8] sm:$0xff]  ;;  %v290_v6 = vld [vmem:[#allocation5 + $0x60] sm:$0xff]  ;;  %v289_v8 = vld [vmem:[#allocation5 + $0x58] sm:$0xff]  ;;  %s455_s7 = sshll.u32 %s451_s29, 4  ;;  %s440_s25 = scalar_lea.sflag [#allocation4], %s935_s24  ;;  %s456_s7 = int_to_ptr.hbm [resolvable:$true] %s455_s7 }
  0x34   : > { %315 = vmatpush.msra.mxu0 %v292_v1  ;;  %v306_v7 = vld [vmem:[#allocation5 + $0xe0] sm:$0xff]  ;;  %v305_v9 = vld [vmem:[#allocation5 + $0xd8] sm:$0xff]  ;;  %v288_v10 = vld [vmem:[#allocation5 + $0x50] sm:$0xff]  ;;  %s741_s22 = sshra.s32 %s456_s7, 4  ;;  %s747_s8 = scalar_lea.hbm %s999_s5, 32  ;;  %s742_s22 = int_to_ptr.hbm [resolvable:$true] %s741_s22 }
  0x35   : > { %335 = vmatpush.msra.mxu1 %v308_v3  ;;  %v304_v11 = vld [vmem:[#allocation5 + $0xd0] sm:$0xff]  ;;  %v287_v12 = vld [vmem:[#allocation5 + $0x48] sm:$0xff]  ;;  %v286_v14 = vld [vmem:[#allocation5 + $0x40] sm:$0xff]  ;;  %s743_s9 = scalar_lea.hbm %s742_s22, 16  ;;  %p748_p12 = scmp.lt.s32.totalorder %s742_s22, %s999_s5 }
  0x36   : > { %316 = vmatpush.msra.mxu0 %v291_v4  ;;  %v303_v13 = vld [vmem:[#allocation5 + $0xc8] sm:$0xff]  ;;  %v385_v15 = vld [vmem:[#allocation7 + $0xf0] sm:$0xff]  ;;  %v386_v16 = vld [vmem:[#allocation7 + $0xf8] sm:$0xff]  ;;  %p744_p1 = scmp.ne.s32.totalorder %s742_s22, %s743_s9  ;;  %p749_p7 = scmp.lt.s32.totalorder %s747_s8, %s743_s9 }
  0x37   : > { %336 = vmatpush.msra.mxu1 %v307_v5  ;;  %v302_v17 = vld [vmem:[#allocation5 + $0xc0] sm:$0xff]  ;;  %393 = vmatpush.msra.mxu2 %v385_v15  ;;  %v384_v19 = vld [vmem:[#allocation7 + $0xe8] sm:$0xff]  ;;  %v381_v20 = vld [vmem:[#allocation7 + $0xd0] sm:$0xff] }
  0x38   : > { %317 = vmatpush.msra.mxu0 %v290_v6  ;;  %413 = vmatpush.msra.mxu3 %v386_v16  ;;  %v383_v18 = vld [vmem:[#allocation7 + $0xe0] sm:$0xff]  ;;  %v382_v21 = vld [vmem:[#allocation7 + $0xd8] sm:$0xff]  ;;  %v380_v25 = vld [vmem:[#allocation7 + $0xc8] sm:$0xff]  ;;  %p745_p3 = pnand %p744_p1, %p904_p4  ;;  %p750_p8 = por %p749_p7, %p748_p12 }
  0x39   : > { %337 = vmatpush.msra.mxu1 %v306_v7  ;;  %v285_v22 = vld [vmem:[#allocation5 + $0x38] sm:$0xff]  ;;  %394 = vmatpush.msra.mxu2 %v383_v18  ;;  %v379_v24 = vld [vmem:[#allocation7 + $0xc0] sm:$0xff]  ;;  %v284_v26 = vld [vmem:[#allocation5 + $0x30] sm:$0xff] }
  0x3a   : > { %318 = vmatpush.msra.mxu0 %v289_v8  ;;  %v301_v23 = vld [vmem:[#allocation5 + $0xb8] sm:$0xff]  ;;  %414 = vmatpush.msra.mxu3 %v384_v19  ;;  %v300_v27 = vld [vmem:[#allocation5 + $0xb0] sm:$0xff]  ;;  %v283_v30 = vld [vmem:[#allocation5 + $0x28] sm:$0xff]  ;;  %p746_p5 = pneg %p745_p3 }
  0x3b   : > { %338 = vmatpush.msra.mxu1 %v305_v9  ;;  %395 = vmatpush.msra.mxu2 %v381_v20  ;;  %v377_v28 = vld [vmem:[#allocation7 + $0xb0] sm:$0xff]  ;;  %v378_v29 = vld [vmem:[#allocation7 + $0xb8] sm:$0xff]  ;;  %v299_v31 = vld [vmem:[#allocation5 + $0xa8] sm:$0xff] }
  0x3c   : > { %319 = vmatpush.msra.mxu0 %v288_v10  ;;  %415 = vmatpush.msra.mxu3 %v382_v21  ;;  %v375_v32 = vld [vmem:[#allocation7 + $0xa0] sm:$0xff]  ;;  %v376_v33 = vld [vmem:[#allocation7 + $0xa8] sm:$0xff]  ;;  %v373_v36 = vld [vmem:[#allocation7 + $0x90] sm:$0xff]  ;;  %p751_p9 = pnand %p750_p8, %p746_p5 }
  0x3d   : > { %339 = vmatpush.msra.mxu1 %v304_v11  ;;  %396 = vmatpush.msra.mxu2 %v379_v24  ;;  %v282_v34 = vld [vmem:[#allocation5 + $0x20] sm:$0xff]  ;;  %v374_v37 = vld [vmem:[#allocation7 + $0x98] sm:$0xff]  ;;  %v372_v41 = vld [vmem:[#allocation7 + $0x88] sm:$0xff] }
  0x3e   : > { %320 = vmatpush.msra.mxu0 %v287_v12  ;;  %416 = vmatpush.msra.mxu3 %v380_v25  ;;  %v298_v35 = vld [vmem:[#allocation5 + $0xa0] sm:$0xff]  ;;  %v281_v38 = vld [vmem:[#allocation5 + $0x18] sm:$0xff]  ;;  %v280_v42 = vld [vmem:[#allocation5 + $0x10] sm:$0xff] }
  0x3f   : > { %340 = vmatpush.msra.mxu1 %v303_v13  ;;  %397 = vmatpush.msra.mxu2 %v377_v28  ;;  %v297_v39 = vld [vmem:[#allocation5 + $0x98] sm:$0xff]  ;;  %v371_v40 = vld [vmem:[#allocation7 + $0x80] sm:$0xff]  ;;  %v296_v43 = vld [vmem:[#allocation5 + $0x90] sm:$0xff] }
  0x40   : > { %321 = vmatpush.msra.mxu0 %v286_v14  ;;  %417 = vmatpush.msra.mxu3 %v378_v29  ;;  %v369_v44 = vld [vmem:[#allocation7 + $0x70] sm:$0xff]  ;;  %v370_v45 = vld [vmem:[#allocation7 + $0x78] sm:$0xff]  ;;  %v279_v46 = vld [vmem:[#allocation5 + $0x8] sm:$0xff] }
  0x41   : > { %341 = vmatpush.msra.mxu1 %v302_v17  ;;  %398 = vmatpush.msra.mxu2 %v375_v32  ;;  %v295_v47 = vld [vmem:[#allocation5 + $0x88] sm:$0xff]  ;;  %v367_v48 = vld [vmem:[#allocation7 + $0x60] sm:$0xff]  ;;  %v365_v54 = vld [vmem:[#allocation7 + $0x50] sm:$0xff] }
  0x42   : > { %322 = vmatpush.msra.mxu0 %v285_v22  ;;  %418 = vmatpush.msra.mxu3 %v376_v33  ;;  %v368_v49 = vld [vmem:[#allocation7 + $0x68] sm:$0xff]  ;;  %v278_v50 = vld [vmem:[#allocation5] sm:$0xff]  ;;  %v366_v55 = vld [vmem:[#allocation7 + $0x58] sm:$0xff] }
  0x43   : > { %342 = vmatpush.msra.mxu1 %v301_v23  ;;  %399 = vmatpush.msra.mxu2 %v373_v36  ;;  %v294_v51 = vld [vmem:[#allocation5 + $0x80] sm:$0xff]  ;;  %v277_v53 = vld [vmem:[%s941_s15 + $0x8] sm:$0xff]  ;;  %v361_v58 = vld [vmem:[#allocation7 + $0x30] sm:$0xff] }
  0x44   : > { %323 = vmatpush.msra.mxu0 %v284_v26  ;;  %419 = vmatpush.msra.mxu3 %v374_v37  ;;  %v276_v52 = vld [vmem:[%s941_s15] sm:$0xff]  ;;  %v364_v57 = vld [vmem:[#allocation7 + $0x48] sm:$0xff]  ;;  %v362_v59 = vld [vmem:[#allocation7 + $0x38] sm:$0xff] }
  0x45   : > { %343 = vmatpush.msra.mxu1 %v300_v27  ;;  %400 = vmatpush.msra.mxu2 %v371_v40  ;;  %v363_v56 = vld [vmem:[#allocation7 + $0x40] sm:$0xff]  ;;  %v360_v61 = vld [vmem:[#allocation7 + $0x28] sm:$0xff]  ;;  %v357_v62 = vld [vmem:[#allocation7 + $0x10] sm:$0xff] }
  0x46   : > { %324 = vmatpush.msra.mxu0 %v283_v30  ;;  %420 = vmatpush.msra.mxu3 %v372_v41  ;;  %v359_v60 = vld [vmem:[#allocation7 + $0x20] sm:$0xff]  ;;  %v358_v63 = vld [vmem:[#allocation7 + $0x18] sm:$0xff]  ;;  %v356_v1 = vld [vmem:[#allocation7 + $0x8] sm:$0xff] }
  0x47   : > { %344 = vmatpush.msra.mxu1 %v299_v31  ;;  %401 = vmatpush.msra.mxu2 %v369_v44  ;;  %v355_v0 = vld [vmem:[#allocation7] sm:$0xff] }
  0x48   : > { %325 = vmatpush.msra.mxu0 %v282_v34  ;;  %421 = vmatpush.msra.mxu3 %v370_v45  ;;  %v636_v2 = vld [vmem:[%s996_s2] ss:$0 sm:$0xff] }
  0x49   : > { %345 = vmatpush.msra.mxu1 %v298_v35  ;;  %402 = vmatpush.msra.mxu2 %v367_v48  ;;  %v387_v8 = vld [vmem:[%s998_s4] sm:$0x3] }
  0x4a   : > { %326 = vmatpush.msra.mxu0 %v281_v38  ;;  %422 = vmatpush.msra.mxu3 %v368_v49  ;;  %v389_v9 = vperm.slane %v387_v8, 0  ;;  %v390_v10 = vperm.slane %v387_v8, 1 }
  0x4b   : > { %346 = vmatpush.msra.mxu1 %v297_v39  ;;  %403 = vmatpush.msra.mxu2 %v365_v54 }
  0x4c   : > { %327 = vmatpush.msra.mxu0 %v280_v42  ;;  %423 = vmatpush.msra.mxu3 %v366_v55 }
  0x4d   : > { %347 = vmatpush.msra.mxu1 %v296_v43  ;;  %404 = vmatpush.msra.mxu2 %v363_v56 }
  0x4e   : > { %328 = vmatpush.msra.mxu0 %v279_v46  ;;  %424 = vmatpush.msra.mxu3 %v364_v57 }
  0x4f   : > { %348 = vmatpush.msra.mxu1 %v295_v47  ;;  %405 = vmatpush.msra.mxu2 %v361_v58 }
  0x50   : > { %329 = vmatpush.msra.mxu0 %v278_v50  ;;  %425 = vmatpush.msra.mxu3 %v362_v59 }
  0x51   : > { %349 = vmatpush.msra.mxu1 %v294_v51  ;;  %330 = vmatmul.f32.vlgmr.msra.gmra.mxu0 %v276_v52 }
  0x52   : > { %350 = vmatmul.f32.vlgmr.msra.gmra.mxu1 %v277_v53  ;;  %406 = vmatpush.msra.mxu2 %v359_v60 }
  0x53   : > { %426 = vmatpush.msra.mxu3 %v360_v61 }
  0x54   : > { %407 = vmatpush.msra.mxu2 %v357_v62 }
  0x55   : > { %427 = vmatpush.msra.mxu3 %v358_v63 }
  0x56   : > { %408 = vmatpush.msra.mxu2 %v355_v0 }
  0x57   : > { %428 = vmatpush.msra.mxu3 %v356_v1 }
  0xce   : > { %v331_v3 = vpop.f32.mrf.mxu0 }
  0xcf   : > { %v351_v4 = vpop.f32.mrf.mxu1  ;;  %v332_v5 = vadd.f32 %v636_v2, %v331_v3 }
  0xd1   : > { %v352_v6 = vadd.f32 %v351_v4, %v332_v5 }
  0xd3   : > { %v354_v7 = vmax.f32 %v352_v6, 0.0 }
  0xd5   : > { %409 = vmatmul.f32.vlgmr.msra.gmra.mxu2 %v354_v7  ;;  %429 = vmatmul.f32.vlgmr.msra.gmra.mxu3 %v354_v7 }
 0x158   : > { %v410_v11 = vpop.f32.mrf.mxu2  ;;  %v430_v12 = vpop.f32.mrf.mxu3 }
 0x159   : > { %v411_v13 = vadd.f32 %v410_v11, %v389_v9  ;;  %v431_v14 = vadd.f32 %v430_v12, %v390_v10 }
 0x15b   : > { %v433_v15 = vadd.f32 %v411_v13, %v276_v52  ;;  %v434_v16 = vadd.f32 %v431_v14, %v277_v53 }
 0x15d   : > { %v435_v17 = vmax.f32 %v433_v15, 0.0  ;;  %v436_v18 = vmax.f32 %v434_v16, 0.0 }
 0x15f   : > { %437 = vst [vmem:[%s275_s30] sm:$0xff] %v435_v17 }
 0x160   : > { %438 = vst [vmem:[%s275_s30 + $0x8] sm:$0xff] %v436_v18 }
 0x161   : > { %754 = shalt.err (!%p751_p9)
}
 0x162   : > { %575 = dma.vmem_to_hbm [thread:$0]  (%p904_p4), %s454_s6, 256, %s456_s7, %s440_s25  }
 0x163 PF: > { %s467_s24 = sand.u32 1, %s785_s18   ;;  %p1006_p10 = scmp.ge.s32.totalorder %s797_s21, 2 }
 0x164   : > { %s468_s11 = scalar_lea.sflag [#allocation4], %s467_s24 }
 0x165   : > { %p589_p13 = pnand %p1006_p10, %p908_p6 }
 0x167   : > { %p590_p11 = pneg %p589_p13 }
 0x169   : > { %780 = dma.done.wait (%p590_p11), %s468_s11, 256  }
 0x16a   : > { %782 = vsyncadd (%p590_p11), %s468_s11, 4294967040  ;;  %p19_p0 = scmp.ge.s32.totalorder %s878_s14, 4   ;;  %s1007_s18 = smov %s789_s19 }
 0x16b   : > { %s1008_s19 = smov %s793_s20  ;;  %s1009_s20 = smov %s889_s17 }
 0x16c   : > { %s1010_s21 = smov %s878_s14  ;;  %21 = sbr.rel (!%p19_p0) target bundleno = 6 (0x6), region = 93 }
 0x171   :  { %474 = vsyncpa [#allocation3], 1 }
 0x172   :  { %476 = vsyncpa [#allocation3 + $0x1], 1 }
 0x173   :  { %477 = vsyncpa [#allocation6], 1 }
 0x174   :  { %478 = vsyncpa [#allocation4], 1 }
 0x175   :  { %480 = vsyncpa [#allocation4 + $0x1], 1 }

</bundles_post_ra>
